<compile_context>
chip_gen: v7x
topology: tpu7x:2x2x1
jax: 0.10.0
libtpu: 0.0.40
codegen_flags: <defaults>
</compile_context>

<pallas_src>
import functools

import jax
import jax.numpy as jnp
from jax.experimental import pallas as pl
from jax.experimental.pallas import tpu as pltpu


def _rup(x, m):
    return (x + m - 1) // m * m


# ----------------------------------------------------------------------------
# Fused matmul kernel: out = relu?( (A @ B) * scale + shift (+ residual) )
# A, B bf16 on the MXU; accumulation and epilogue in f32.
# ----------------------------------------------------------------------------
def _mm_fused_kernel(a_ref, b_ref, s_ref, t_ref, *rest, relu, has_residual):
    if has_residual:
        r_ref, o_ref, acc_ref = rest
    else:
        o_ref, acc_ref = rest

    @pl.when(pl.program_id(2) == 0)
    def _():
        acc_ref[...] = jnp.zeros_like(acc_ref)

    acc_ref[...] += jnp.dot(a_ref[...], b_ref[...],
                            preferred_element_type=jnp.float32)

    @pl.when(pl.program_id(2) == pl.num_programs(2) - 1)
    def _():
        y = acc_ref[...] * s_ref[...] + t_ref[...]
        if has_residual:
            y = y + r_ref[...]
        if relu:
            y = jnp.maximum(y, 0.0)
        o_ref[...] = y


def _choose_tk(K):
    """Pick a 128-aligned K tile minimizing padding (tie-break: larger tile)."""
    best_kp, best_tk = None, None
    for tk in (512, 384, 256, 128):
        kp = _rup(K, tk)
        if best_kp is None or kp < best_kp or (kp == best_kp and tk > best_tk):
            best_kp, best_tk = kp, tk
    return best_tk, best_kp


def matmul_fused(a, b, scale, shift, residual=None, relu=False):
    """(M,K) @ (K,N) with fused per-output-channel affine (+residual, +relu)."""
    M, K = a.shape
    _, N = b.shape

    tm = min(256, _rup(M, 16))          # 16-aligned for bf16 sublane packing
    Mp = _rup(M, tm)
    tn = min(256, _rup(N, 128))
    Np = _rup(N, tn)
    # Keep >= 2 independent (M,N) tiles when possible (v7x has 2 TensorCores).
    if (Mp // tm) * (Np // tn) < 2 and tn > 128:
        tn = 128
        Np = _rup(N, tn)
    tk, Kp = _choose_tk(K)

    a_p = jnp.pad(a.astype(jnp.bfloat16), ((0, Mp - M), (0, Kp - K)))
    b_p = jnp.pad(b.astype(jnp.bfloat16), ((0, Kp - K), (0, Np - N)))
    s_p = jnp.pad(scale.astype(jnp.float32), (0, Np - N)).reshape(1, Np)
    t_p = jnp.pad(shift.astype(jnp.float32), (0, Np - N)).reshape(1, Np)

    in_specs = [
        pl.BlockSpec((tm, tk), lambda i, j, k: (i, k)),
        pl.BlockSpec((tk, tn), lambda i, j, k: (k, j)),
        pl.BlockSpec((1, tn), lambda i, j, k: (0, j)),
        pl.BlockSpec((1, tn), lambda i, j, k: (0, j)),
    ]
    args = [a_p, b_p, s_p, t_p]
    if residual is not None:
        r_p = jnp.pad(residual.astype(jnp.float32), ((0, Mp - M), (0, Np - N)))
        in_specs.append(pl.BlockSpec((tm, tn), lambda i, j, k: (i, j)))
        args.append(r_p)

    kernel = functools.partial(_mm_fused_kernel, relu=relu,
                               has_residual=residual is not None)
    out = pl.pallas_call(
        kernel,
        out_shape=jax.ShapeDtypeStruct((Mp, Np), jnp.float32),
        grid_spec=pltpu.PrefetchScalarGridSpec(
            num_scalar_prefetch=0,
            grid=(Mp // tm, Np // tn, Kp // tk),
            in_specs=in_specs,
            out_specs=pl.BlockSpec((tm, tn), lambda i, j, k: (i, j)),
            scratch_shapes=[pltpu.VMEM((tm, tn), jnp.float32)]),
        compiler_params=pltpu.CompilerParams(
            dimension_semantics=("parallel", "parallel", "arbitrary")),
    )(*args)
    return out[:M, :N]


# ----------------------------------------------------------------------------
# 3-way elementwise max kernel (used by the separable max-pool)
# ----------------------------------------------------------------------------
def _max3_kernel(a_ref, b_ref, c_ref, o_ref):
    o_ref[...] = jnp.maximum(jnp.maximum(a_ref[...], b_ref[...]), c_ref[...])


def _max3(a, b, c):
    M, C = a.shape
    tm = min(512, _rup(M, 8))
    Mp, Cp = _rup(M, tm), _rup(C, 128)
    pad2 = lambda t: jnp.pad(t, ((0, Mp - M), (0, Cp - C)))
    out = pl.pallas_call(
        _max3_kernel,
        out_shape=jax.ShapeDtypeStruct((Mp, Cp), jnp.float32),
        grid=(Mp // tm,),
        in_specs=[pl.BlockSpec((tm, Cp), lambda i: (i, 0))] * 3,
        out_specs=pl.BlockSpec((tm, Cp), lambda i: (i, 0)),
        compiler_params=pltpu.CompilerParams(
            dimension_semantics=("parallel",)),
    )(pad2(a), pad2(b), pad2(c))
    return out[:M, :C]


# ----------------------------------------------------------------------------
# Conv / pool wrappers (im2col glue in JAX, matmul / reductions in Pallas)
# ----------------------------------------------------------------------------
def _im2col(x, kh, kw, stride, pad):
    """x: NHWC -> patches (N*Ho*Wo, kh*kw*Cin); pad is int or ((t,b),(l,r))."""
    N, H, W, C = x.shape
    if isinstance(pad, int):
        pad = ((pad, pad), (pad, pad))
    (ph0, ph1), (pw0, pw1) = pad
    xp = jnp.pad(x, ((0, 0), (ph0, ph1), (pw0, pw1), (0, 0)))
    Hp, Wp = H + ph0 + ph1, W + pw0 + pw1
    Ho = (Hp - kh) // stride + 1
    Wo = (Wp - kw) // stride + 1
    cols = []
    for i in range(kh):
        for j in range(kw):
            cols.append(xp[:, i:i + (Ho - 1) * stride + 1:stride,
                           j:j + (Wo - 1) * stride + 1:stride, :])
    patches = jnp.concatenate(cols, axis=-1)          # (N,Ho,Wo, kh*kw*C)
    return patches.reshape(N * Ho * Wo, kh * kw * C), (N, Ho, Wo)


def conv2d_fused(x, w, stride, pad, scale, shift, relu, residual=None):
    """x: NHWC, w: PyTorch Conv2d layout (Cout, Cin, kh, kw).
    Fuses per-channel affine (BN or bias) + optional residual + ReLU."""
    Cout, Cin, kh, kw = w.shape
    patches, (N, Ho, Wo) = _im2col(x, kh, kw, stride, pad)
    wm = jnp.transpose(w, (2, 3, 1, 0)).reshape(kh * kw * Cin, Cout)
    y = matmul_fused(patches, wm, scale, shift, residual=residual, relu=relu)
    return y.reshape(N, Ho, Wo, Cout)


def maxpool2d_3x3_s2_p1(x):
    """3x3 / stride-2 / pad-1 max-pool as separable row-max then col-max."""
    N, H, W, C = x.shape
    xp = jnp.pad(x, ((0, 0), (1, 1), (0, 0), (0, 0)),
                 constant_values=-jnp.inf)
    Ho = (H + 2 - 3) // 2 + 1
    rsl = lambda i: xp[:, i:i + (Ho - 1) * 2 + 1:2].reshape(-1, C)
    rows = _max3(rsl(0), rsl(1), rsl(2)).reshape(N, Ho, W, C)

    rp = jnp.pad(rows, ((0, 0), (0, 0), (1, 1), (0, 0)),
                 constant_values=-jnp.inf)
    Wo = (W + 2 - 3) // 2 + 1
    csl = lambda j: rp[:, :, j:j + (Wo - 1) * 2 + 1:2].reshape(-1, C)
    return _max3(csl(0), csl(1), csl(2)).reshape(N, Ho, Wo, C)


def bn_affine(bn, eps=1e-5):
    """Eval-mode BatchNorm as a per-channel (scale, shift)."""
    scale = bn["gamma"] / jnp.sqrt(bn["var"] + eps)
    shift = bn["beta"] - bn["mean"] * scale
    return scale, shift


# ----------------------------------------------------------------------------
# ConvTranspose2d (k=4, s=2, p=1, out_pad=0) via sub-pixel phase decomposition:
# four 2x2 convs over the undilated input, then pixel-shuffle. No zero taps.
# ----------------------------------------------------------------------------
def _phase_kernel(w, dy, dx):
    """w: (Cin, Cout, 4, 4). Return equivalent 2x2 Conv2d kernel (Cout,Cin,2,2)."""
    taps = ((3, 1), (2, 0))       # taps[phase] = kernel index for window offset 0,1
    kh, kw = taps[dy], taps[dx]
    rows = []
    for r in range(2):
        rows.append(jnp.stack([w[:, :, kh[r], kw[c]] for c in range(2)], axis=-1))
    wk = jnp.stack(rows, axis=-2)            # (Cin, Cout, 2, 2)
    return jnp.transpose(wk, (1, 0, 2, 3))   # (Cout, Cin, 2, 2)


def deconv4x4_s2_p1_bn_relu(x, w, bn):
    """x: NHWC, w: PyTorch ConvTranspose2d layout (Cin, Cout, 4, 4)."""
    N, H, W, _ = x.shape
    Cout = w.shape[1]
    scale, shift = bn_affine(bn)
    ph = {}
    for dy in (0, 1):
        for dx in (0, 1):
            wk = _phase_kernel(w, dy, dx)
            pad_h = (1, 0) if dy == 0 else (0, 1)
            pad_w = (1, 0) if dx == 0 else (0, 1)
            ph[(dy, dx)] = conv2d_fused(x, wk, stride=1, pad=(pad_h, pad_w),
                                        scale=scale, shift=shift, relu=True)
    row0 = jnp.stack([ph[(0, 0)], ph[(0, 1)]], axis=3)   # (N,H,W,2,C)
    row1 = jnp.stack([ph[(1, 0)], ph[(1, 1)]], axis=3)
    both = jnp.stack([row0, row1], axis=2)               # (N,H,2,W,2,C)
    return both.reshape(N, 2 * H, 2 * W, Cout)


# ----------------------------------------------------------------------------
# Model definition (BasicBlock / ResNet18, deconv head, final 1x1 conv)
# ----------------------------------------------------------------------------
class KeyGen:
    def __init__(self, seed=0):
        self.key = jax.random.PRNGKey(seed)

    def __call__(self):
        self.key, sub = jax.random.split(self.key)
        return sub


def _conv_w(kg, cout, cin, k):
    return jax.random.normal(kg(), (cout, cin, k, k), jnp.float32) * 0.001


def _make_bn(c):
    return dict(gamma=jnp.ones((c,), jnp.float32),
                beta=jnp.zeros((c,), jnp.float32),
                mean=jnp.zeros((c,), jnp.float32),
                var=jnp.ones((c,), jnp.float32))


def _make_basic_block(kg, inplanes, planes, stride):
    p = dict(stride=stride,
             conv1=_conv_w(kg, planes, inplanes, 3), bn1=_make_bn(planes),
             conv2=_conv_w(kg, planes, planes, 3), bn2=_make_bn(planes))
    if stride != 1 or inplanes != planes:  # BasicBlock.expansion == 1
        p["down_conv"] = _conv_w(kg, planes, inplanes, 1)
        p["down_bn"] = _make_bn(planes)
    return p


def _make_layer(kg, inplanes, planes, blocks, stride):
    layer = [_make_basic_block(kg, inplanes, planes, stride)]
    for _ in range(1, blocks):
        layer.append(_make_basic_block(kg, planes, planes, 1))
    return layer, planes


def make_pose_resnet_params(seed=0, layers=(2, 2, 2, 2),
                            deconv_filters=(256, 256, 256), num_joints=33):
    kg = KeyGen(seed)
    params = {}
    params["conv1"] = _conv_w(kg, 64, 3, 7)
    params["bn1"] = _make_bn(64)
    inplanes = 64
    params["layer1"], inplanes = _make_layer(kg, inplanes, 64, layers[0], 1)
    params["layer2"], inplanes = _make_layer(kg, inplanes, 128, layers[1], 2)
    params["layer3"], inplanes = _make_layer(kg, inplanes, 256, layers[2], 2)
    params["layer4"], inplanes = _make_layer(kg, inplanes, 512, layers[3], 2)
    deconvs = []
    for planes in deconv_filters:  # kernel 4, stride 2, pad 1, out_pad 0, no bias
        w = jax.random.normal(kg(), (inplanes, planes, 4, 4), jnp.float32) * 0.001
        deconvs.append(dict(w=w, bn=_make_bn(planes)))
        inplanes = planes
    params["deconv"] = deconvs
    # FINAL_CONV_KERNEL == 1 -> padding 0
    params["final_w"] = _conv_w(kg, num_joints, inplanes, 1)
    params["final_b"] = jnp.zeros((num_joints,), jnp.float32)
    return params


def _basic_block_fwd(x, p):
    s1, t1 = bn_affine(p["bn1"])
    out = conv2d_fused(x, p["conv1"], stride=p["stride"], pad=1,
                       scale=s1, shift=t1, relu=True)
    if "down_conv" in p:
        sd, td = bn_affine(p["down_bn"])
        residual = conv2d_fused(x, p["down_conv"], stride=p["stride"], pad=0,
                                scale=sd, shift=td, relu=False)
    else:
        residual = x
    Cout = out.shape[-1]
    s2, t2 = bn_affine(p["bn2"])
    # conv2 + bn2 + residual-add + relu, all fused into one matmul epilogue.
    out = conv2d_fused(out, p["conv2"], stride=1, pad=1,
                       scale=s2, shift=t2, relu=True,
                       residual=residual.reshape(-1, Cout))
    return out


def pose_resnet_forward(params, x_nchw):
    """Matches PoseResNet.forward: returns (heatmaps, final_feature, img_feat), NCHW."""
    x = jnp.transpose(x_nchw, (0, 2, 3, 1)).astype(jnp.float32)  # -> NHWC
    s1, t1 = bn_affine(params["bn1"])
    x = conv2d_fused(x, params["conv1"], stride=2, pad=3,
                     scale=s1, shift=t1, relu=True)               # conv1+bn1+relu
    x = maxpool2d_3x3_s2_p1(x)
    for lname in ("layer1", "layer2", "layer3", "layer4"):
        for blk in params[lname]:
            x = _basic_block_fwd(x, blk)
    img_feat = x
    for d in params["deconv"]:
        x = deconv4x4_s2_p1_bn_relu(x, d["w"], d["bn"])
    x_final_feature = x
    nj = params["final_w"].shape[0]
    x = conv2d_fused(x, params["final_w"], stride=1, pad=0,
                     scale=jnp.ones((nj,), jnp.float32),
                     shift=params["final_b"], relu=False)          # conv + bias
    to_nchw = lambda t: jnp.transpose(t, (0, 3, 1, 2))
    return to_nchw(x), to_nchw(x_final_feature), to_nchw(img_feat)


if __name__ == "__main__":
    # Small shapes: batch=2, 3 input channels (conv1 requires 3), 64x64 spatial.
    key = jax.random.PRNGKey(0)
    x = jax.random.normal(key, (2, 3, 64, 64), jnp.float32)

    params = make_pose_resnet_params(seed=0)
    heatmaps, final_feat, img_feat = pose_resnet_forward(params, x)
    jax.block_until_ready((heatmaps, final_feat, img_feat))

    assert heatmaps.shape == (2, 33, 16, 16), heatmaps.shape
    assert final_feat.shape == (2, 256, 16, 16), final_feat.shape
    assert img_feat.shape == (2, 512, 2, 2), img_feat.shape
    assert jnp.all(jnp.isfinite(heatmaps))
    assert jnp.all(jnp.isfinite(final_feat))
    print("KERNEL_OK")
</pallas_src>

<mosaic_0001>
module attributes {stable_mosaic.version = 11 : i64} {
  func.func @_mm_fused_kernel(%arg0: i32, %arg1: i32, %arg2: i32, %arg3: memref<256x256xbf16, #tpu.memory_space<vmem>>, %arg4: memref<256x128xbf16, #tpu.memory_space<vmem>>, %arg5: memref<1x128xf32, #tpu.memory_space<vmem>>, %arg6: memref<1x128xf32, #tpu.memory_space<vmem>>, %arg7: memref<256x128xf32, #tpu.memory_space<vmem>>, %arg8: memref<256x128xf32, #tpu.memory_space<vmem>>) attributes {dimension_semantics = [#tpu.dimension_semantics<parallel>, #tpu.dimension_semantics<parallel>, #tpu.dimension_semantics<arbitrary>], iteration_bounds = array<i64: 8, 1, 1>, scalar_prefetch = 0 : i64, scratch_operands = 1 : i64, tpu.core_type = #tpu.core_type<tc>, window_params = [{transform_indices = @transform_0, window_bounds = array<i64: 256, 256>}, {transform_indices = @transform_1, window_bounds = array<i64: 256, 128>}, {transform_indices = @transform_2, window_bounds = array<i64: 1, 128>}, {transform_indices = @transform_3, window_bounds = array<i64: 1, 128>}, {transform_indices = @transform_4, window_bounds = array<i64: 256, 128>}]} {
    %c0_i32 = arith.constant 0 : i32
    %0 = arith.cmpi eq, %arg2, %c0_i32 : i32
    %1 = arith.extui %0 : i1 to i32
    %c0_i32_0 = arith.constant 0 : i32
    %2 = arith.cmpi ne, %1, %c0_i32_0 : i32
    scf.if %2 {
      %cst_10 = arith.constant 0.000000e+00 : f32
      %12 = vector.broadcast %cst_10 : f32 to vector<256x128xf32>
      %c0_11 = arith.constant 0 : index
      %c0_12 = arith.constant 0 : index
      %13 = vector.load %arg8[%c0_11, %c0_12] : memref<256x128xf32, #tpu.memory_space<vmem>>, vector<256x128xf32>
      tpu.vector_store %arg8[%c0_11, %c0_12], %12 {strides = array<i32>} : memref<256x128xf32, #tpu.memory_space<vmem>>, vector<256x128xf32>,
    } else {
    }
    %c0 = arith.constant 0 : index
    %c0_1 = arith.constant 0 : index
    %3 = vector.load %arg8[%c0, %c0_1] : memref<256x128xf32, #tpu.memory_space<vmem>>, vector<256x128xf32>
    %c0_2 = arith.constant 0 : index
    %c0_3 = arith.constant 0 : index
    %4 = vector.load %arg3[%c0_2, %c0_3] : memref<256x256xbf16, #tpu.memory_space<vmem>>, vector<256x256xbf16>
    %c0_4 = arith.constant 0 : index
    %c0_5 = arith.constant 0 : index
    %5 = vector.load %arg4[%c0_4, %c0_5] : memref<256x128xbf16, #tpu.memory_space<vmem>>, vector<256x128xbf16>
    %cst = arith.constant dense<0.000000e+00> : vector<256x128xf32>
    %6 = tpu.matmul %4, %5, %cst {dimension_numbers = #tpu.dot_dimension_numbers<[1], [0], [0], [1], [0, 0, 1, 1], [], []>} : vector<256x256xbf16>, vector<256x128xbf16>, vector<256x128xf32> -> vector<256x128xf32>
    %7 = arith.addf %3, %6 : vector<256x128xf32>
    %c0_6 = arith.constant 0 : index
    %c0_7 = arith.constant 0 : index
    %8 = vector.load %arg8[%c0_6, %c0_7] : memref<256x128xf32, #tpu.memory_space<vmem>>, vector<256x128xf32>
    tpu.vector_store %arg8[%c0_6, %c0_7], %7 {strides = array<i32>} : memref<256x128xf32, #tpu.memory_space<vmem>>, vector<256x128xf32>,
    %c0_i32_8 = arith.constant 0 : i32
    %9 = arith.cmpi eq, %arg2, %c0_i32_8 : i32
    %10 = arith.extui %9 : i1 to i32
    %c0_i32_9 = arith.constant 0 : i32
    %11 = arith.cmpi ne, %10, %c0_i32_9 : i32
    scf.if %11 {
      %c0_10 = arith.constant 0 : index
      %c0_11 = arith.constant 0 : index
      %12 = vector.load %arg8[%c0_10, %c0_11] : memref<256x128xf32, #tpu.memory_space<vmem>>, vector<256x128xf32>
      %c0_12 = arith.constant 0 : index
      %c0_13 = arith.constant 0 : index
      %13 = vector.load %arg5[%c0_12, %c0_13] : memref<1x128xf32, #tpu.memory_space<vmem>>, vector<1x128xf32>
      %14 = vector.broadcast %13 : vector<1x128xf32> to vector<256x128xf32>
      %15 = arith.mulf %12, %14 : vector<256x128xf32>
      %c0_14 = arith.constant 0 : index
      %c0_15 = arith.constant 0 : index
      %16 = vector.load %arg6[%c0_14, %c0_15] : memref<1x128xf32, #tpu.memory_space<vmem>>, vector<1x128xf32>
      %17 = vector.broadcast %16 : vector<1x128xf32> to vector<256x128xf32>
      %18 = arith.addf %15, %17 : vector<256x128xf32>
      %cst_16 = arith.constant 0.000000e+00 : f32
      %19 = vector.broadcast %cst_16 : f32 to vector<256x128xf32>
      %20 = arith.maximumf %18, %19 : vector<256x128xf32>
      %c0_17 = arith.constant 0 : index
      %c0_18 = arith.constant 0 : index
      %21 = vector.load %arg7[%c0_17, %c0_18] : memref<256x128xf32, #tpu.memory_space<vmem>>, vector<256x128xf32>
      tpu.vector_store %arg7[%c0_17, %c0_18], %20 {strides = array<i32>} : memref<256x128xf32, #tpu.memory_space<vmem>>, vector<256x128xf32>,
    } else {
    }
    return
  }
  func.func @transform_0(%arg0: i32, %arg1: i32, %arg2: i32) -> (i32, i32) {
    %c0_i32 = arith.constant 0 : i32
    return %arg0, %arg2 : i32, i32
  }
  func.func @transform_1(%arg0: i32, %arg1: i32, %arg2: i32) -> (i32, i32) {
    %c0_i32 = arith.constant 0 : i32
    return %arg2, %arg1 : i32, i32
  }
  func.func @transform_2(%arg0: i32, %arg1: i32, %arg2: i32) -> (i32, i32) {
    %c0_i32 = arith.constant 0 : i32
    %c0_i32_0 = arith.constant 0 : i32
    return %c0_i32, %arg1 : i32, i32
  }
  func.func @transform_3(%arg0: i32, %arg1: i32, %arg2: i32) -> (i32, i32) {
    %c0_i32 = arith.constant 0 : i32
    %c0_i32_0 = arith.constant 0 : i32
    return %c0_i32, %arg1 : i32, i32
  }
  func.func @transform_4(%arg0: i32, %arg1: i32, %arg2: i32) -> (i32, i32) {
    %c0_i32 = arith.constant 0 : i32
    return %arg0, %arg1 : i32, i32
  }
}

</mosaic_0001>

<bundles_post_ra>
// kernel: tpu_custom_call.1
= control target key start
LH: loop header
LB: loop body
LE: loop exit
PB: predicated region body
PF: predicated region fallthrough
CT: control target
= control target key end

     0   :  { %9 = vsyncpa [#allocation4], 0  ;;  %s2121_s0 = inlined_call_operand.hbm [shape: bf16[2048,256], index: 0, kind: input, shape index: {}]   ;;  %s2122_s1 = inlined_call_operand.hbm [shape: bf16[256,128], index: 1, kind: input, shape index: {}]   ;;  %s2123_s2 = inlined_call_operand.vmem [shape: f32[1,128], index: 2, kind: input, shape index: {}]   ;;  %s2124_s3 = inlined_call_operand.vmem [shape: f32[1,128], index: 3, kind: input, shape index: {}]   ;;  %s2125_s4 = inlined_call_operand.hbm [shape: f32[2048,128], index: 4, kind: output, shape index: {}]  }
   0x1   :  { %11 = vsyncpa [#allocation4 + $0x1], 0 }
   0x2   :  { %12 = vsyncpa [#allocation7], 0 }
   0x3   :  { %13 = vsyncpa [#allocation5], 0 }
   0x4   :  { %15 = vsyncpa [#allocation5 + $0x1], 0  ;;  %s1757_s15 = smov 0   ;;  %s1759_s16 = smov 0  }
   0x5   :  { %s1761_s17 = smov 0   ;;  %s1763_s18 = smov 0  }
   0x6   :  { %s1765_s19 = smov 0   ;;  %s1767_s20 = smov 0  }
   0x7 LB: > { %s1233_s21 = sadd.s32 4294967295, %s1721_s20   ;;  %s1234_s22 = sadd.s32 4294967294, %s1721_s20   ;;  %s1721_s20 = sphi %s1767_s20, %s21_s20   ;;  %s1717_s19 = sphi %s1765_s19, %s2148_s19   ;;  %s1713_s18 = sphi %s1763_s18, %s2147_s18   ;;  %s1709_s17 = sphi %s1761_s17, %s2146_s17   ;;  %s1705_s16 = sphi %s1759_s16, %s2145_s16   ;;  %s1701_s15 = sphi %s1757_s15, %s2144_s15  }
   0x8   : > { %p62_p0 = scmp.ne.s32.totalorder %s1705_s16, %s1701_s15  ;;  %p1791_p1 = scmp.eq.s32.totalorder %s1233_s21, 0 }
   0x9   : > { %p1795_p2 = scmp.eq.s32.totalorder %s1233_s21, 7  ;;  %p174_p3 = scmp.eq.s32.totalorder %s1234_s22, 7 }
   0xa   : > { %s2130_s23 = scalar_select %p1791_p1, 1, 0 }
   0xb   : > { %s2131_s24 = scalar_select %p1795_p2, 1, 0 }
   0xc   : > { %p1801_p4 = por %p1791_p1, %p62_p0  ;;  %p1235_p5 = scmp.ge.s32.totalorder %s1721_s20, 1 }
   0xd   : > { %p1806_p6 = por %p174_p3, %p62_p0  ;;  %p181_p7 = scmp.lt.s32.totalorder %s1721_s20, 9 }
   0xe   : > { %s2132_s25 = scalar_select %p1801_p4, 1, 0 }
   0xf   : > { %s2133_s26 = scalar_select %p1806_p6, 1, 0 }
  0x10   : > { %p1811_p8 = pnand %p1235_p5, %p181_p7  ;;  %s1723_s28 = smov [#allocation6]  }
  0x11   : > { %s197_s29 = sshll.u32 %s1723_s28, 4  ;;  %s40_s5 = sadd.s32 1, %s1717_s19  ;;  %s198_s29 = int_to_ptr.vmem [resolvable:$true] %s197_s29 }
  0x12   : > { %s2134_s27 = scalar_select %p1811_p8, 1, 0 }
  0x13   : > { %p1442_p9 = pneg %p1811_p8  ;;  %s1577_s8 = scalar_lea.hbm %s2122_s1, 2048 }
  0x14   : > { %p1578_p11 = scmp.ne.s32.totalorder %s2122_s1, %s1577_s8  ;;  %p1584_p3 = scmp.lt.u32.totalorder %s1577_s8, %s2122_s1 }
  0x15   : > { %p1819_p10 = pnand %p1442_p9, %p1791_p1 }
  0x17   : > { %p1579_p12 = pneg %p1819_p10 }
  0x19   : > { %p1580_p13 = pnand %p1579_p12, %p1578_p11 }
  0x1b   : > { %p1581_p0 = pneg %p1580_p13 }
  0x1d   : > { %p1586_p5 = pnand %p1584_p3, %p1581_p0 }
  0x1f   : > { %1589 = shalt.err (!%p1586_p5)
}
  0x20   : > { %s1590_s13 = scalar_lea.vmem %s198_s29, 2048  ;;  %p1598_p1 = scmp.lt.s32.totalorder %s198_s29, %s198_s29 }
  0x21   : > { %p1591_p7 = scmp.ne.s32.totalorder %s198_s29, %s1590_s13  ;;  %p1599_p4 = scmp.lt.s32.totalorder %s1590_s13, %s1590_s13 }
  0x23   : > { %p1593_p9 = pnand %p1591_p7, %p1579_p12  ;;  %p1600_p8 = por %p1599_p4, %p1598_p1 }
  0x25   : > { %p1594_p6 = pneg %p1593_p9 }
  0x27   : > { %p1601_p2 = pnand %p1600_p8, %p1594_p6 }
  0x29   : > { %1604 = shalt.err (!%p1601_p2)
}
  0x2a   : > { %s1724_s14 = smov 64   ;;  %s1725_s21 = smov 4  }
  0x2b   : > { %1445 = dma.hbm_to_vmem [thread:$0]  (!%p1819_p10), %s2122_s1, 2048, %s198_s29, [#allocation7], %s1724_s14, %s1724_s14, %s1725_s21  }
  0x2c   : > { %p42_p1 = scmp.ge.s32.totalorder %s40_s5, 8  ;;  %s49_s6 = sadd.s32 1, %s1709_s17 }
  0x2d   : > { %p56_p2 = scmp.ne.s32.totalorder %s1709_s17, %s1705_s16  ;;  %p57_p4 = scmp.eq.s32.totalorder %s1721_s20, 0 }
  0x2e   : > { %s2150_s5 = smov (%p42_p1, %s40_s5), 0  ;;  %p2137_p8 = scmp.ne.s32.totalorder %s2131_s24, 0 }
  0x2f   : > { %p1846_p6 = por %p57_p4, %p56_p2  ;;  %s44_s30 = ssub.s32 %s1717_s19, %s2150_s5 }
  0x30   : > { %p1852_p11 = por %p2137_p8, %p56_p2  ;;  %p1455_p12 = scmp.lt.s32.totalorder %s1721_s20, 8 }
  0x31   : > { %p47_p10 = scmp.eq.s32.totalorder %s44_s30, 0  ;;  %s223_s29 = sand.u32 1, %s1709_s17  }
  0x32   : > { %s1240_s9 = sshll.u32 %s223_s29, 8  ;;  %s1304_s11 = sshll.u32 %s1717_s19, 12 }
  0x33   : > { %s1861_s10 = scalar_select %p47_p10, %s1709_s17, %s49_s6  }
  0x34   : > { %s1867_s14 = scalar_lea.hbm %s2121_s0, %s1304_s11  ;;  %s227_s24 = scalar_lea.vmem [#allocation3], %s1240_s9 }
  0x35   : > { %s237_s21 = sshll.u32 %s227_s24, 4  ;;  %p1873_p13 = pnand %p1455_p12, %p1846_p6  ;;  %s1869_s21 = int_to_ptr.vmem [resolvable:$true] %s237_s21 }
  0x36   : > { %s1877_s28 = scalar_lea.sflag [#allocation4], %s223_s29  ;;  %s1605_s6 = scalar_lea.hbm %s1867_s14, 4096 }
  0x37   : > { %p1606_p0 = scmp.ne.s32.totalorder %s1867_s14, %s1605_s6  ;;  %p1607_p3 = pneg %p1873_p13 }
  0x38   : > { %s1610_s7 = scalar_lea.hbm %s2121_s0, 32768  ;;  %p1611_p9 = scmp.lt.u32.totalorder %s1867_s14, %s2121_s0 }
  0x39   : > { %p1608_p5 = pnand %p1607_p3, %p1606_p0  ;;  %p1612_p1 = scmp.lt.u32.totalorder %s1610_s7, %s1605_s6 }
  0x3a   : > { %p1614_p4 = scmp.lt.u32.totalorder %s1605_s6, %s1867_s14 }
  0x3b   : > { %p1609_p7 = pneg %p1608_p5  ;;  %p1613_p2 = por %p1612_p1, %p1611_p9 }
  0x3d   : > { %p1615_p6 = por %p1614_p4, %p1613_p2 }
  0x3f   : > { %p1616_p8 = pnand %p1615_p6, %p1609_p7 }
  0x41   : > { %1619 = shalt.err (!%p1616_p8)
}
  0x42   : > { %s1620_s29 = scalar_lea.vmem %s1869_s21, 4096  ;;  %s1726_s13 = smov [#allocation3]  }
  0x43   : > { %p1621_p12 = scmp.ne.s32.totalorder %s1869_s21, %s1620_s29  ;;  %s1625_s24 = sshll.u32 %s1726_s13, 4  ;;  %s1626_s24 = int_to_ptr.vmem [resolvable:$false] %s1625_s24 }
  0x44   : > { %s1627_s30 = scalar_lea.vmem %s1626_s24, 8192  ;;  %p1628_p5 = scmp.lt.s32.totalorder %s1869_s21, %s1626_s24 }
  0x45   : > { %p1623_p10 = pnand %p1621_p12, %p1607_p3  ;;  %p1629_p9 = scmp.lt.s32.totalorder %s1627_s30, %s1620_s29 }
  0x47   : > { %p1624_p0 = pneg %p1623_p10  ;;  %p1630_p1 = por %p1629_p9, %p1628_p5 }
  0x49   : > { %p1631_p2 = pnand %p1630_p1, %p1624_p0 }
  0x4b   : > { %1634 = shalt.err (!%p1631_p2)
}
  0x4c   : > { %s1727_s6 = smov 128   ;;  %s1728_s9 = smov 8  }
  0x4d   : > { %1449 = dma.hbm_to_vmem [thread:$0]  (!%p1873_p13), %s1867_s14, 4096, %s1869_s21, %s1877_s28, %s1727_s6, %s1727_s6, %s1728_s9  }
  0x4e   : > { %p2140_p3 = scmp.ne.s32.totalorder %s2134_s27, 0 }
  0x4f   : > { %s1908_s7 = sand.u32 (!%p2140_p3), 1, %s1705_s16   ;;  %p2141_p7 = scmp.ne.s32.totalorder (!%p2140_p3), %s2132_s25, 0 }
  0x50   : > { %249 = sbr.rel (%p2140_p3) target bundleno = 419 (0x1a3), region = 36  ;;  %s1245_s11 = sshll.u32 (!%p2140_p3), %s1908_s7, 8 }
  0x51   : > { %s252_s12 = scalar_lea.sflag (!%p2140_p3), [#allocation4], %s1908_s7  ;;  %s1914_s29 = scalar_lea.vmem (!%p2140_p3), [#allocation3], %s1245_s11 }
  0x57   : > { %1688 = dma.done.wait (%p2141_p7), %s252_s12, 4096  }
  0x58   : > { %1690 = vsyncadd (%p2141_p7), %s252_s12, 4294963200  ;;  %p2142_p13 = scmp.ne.s32.totalorder %s2130_s23, 0 }
  0x5a   : > { %1692 = dma.done.wait (%p2142_p13), [#allocation7], 2048  }
  0x5b   : > { %1694 = vsyncadd (%p2142_p13), [#allocation7], 4294965248  ;;  %v1513_v0 = vld [vmem:[#allocation6 + $0x40] sm:$0xff]   ;;  %v1515_v2 = vld [vmem:[#allocation6 + $0x48] sm:$0xff]   ;;  %s1976_s21 = scalar_lea.vmem [#allocation8], %s1245_s11  ;;  %s1305_s22 = sshll.u32 %s1713_s18, 12 }
  0x5c   : > { %v1514_v1 = vld [vmem:[#allocation6] sm:$0xff]   ;;  %1306 = vmatprep.subr.bf16.mxu0 %v1513_v0  ;;  %1418 = vmatprep.subr.bf16.mxu1 %v1513_v0  ;;  %v1516_v3 = vld [vmem:[#allocation6 + $0x8] sm:$0xff]   ;;  %v1517_v4 = vld [vmem:[#allocation6 + $0x50] sm:$0xff]   ;;  %s1106_s28 = sshll.u32 %s1976_s21, 4  ;;  %s2067_s30 = scalar_lea.hbm %s2125_s4, %s1305_s22  ;;  %s2069_s28 = int_to_ptr.vmem [resolvable:$true] %s1106_s28 }
  0x5d   : > { %1307 = vmatpush3.bf16.msra.mxu0 %v1514_v1  ;;  %1426 = vmatpush3.bf16.msra.mxu1 %v1514_v1  ;;  %v1518_v5 = vld [vmem:[#allocation6 + $0x10] sm:$0xff]   ;;  %v1519_v6 = vld [vmem:[#allocation6 + $0x58] sm:$0xff]   ;;  %v1521_v8 = vld [vmem:[#allocation6 + $0x60] sm:$0xff]   ;;  %s1092_s18 = scalar_lea.sflag [#allocation5], %s1908_s7  ;;  %s1635_s6 = scalar_lea.vmem %s2069_s28, 4096 }
  0x5e   : > { %1308 = vmatprep.subr.bf16.mxu0 %v1515_v2  ;;  %1419 = vmatprep.subr.bf16.mxu1 %v1515_v2  ;;  %v1520_v7 = vld [vmem:[#allocation6 + $0x18] sm:$0xff]   ;;  %v1522_v9 = vld [vmem:[#allocation6 + $0x20] sm:$0xff]   ;;  %v1523_v10 = vld [vmem:[#allocation6 + $0x68] sm:$0xff]   ;;  %p1636_p4 = scmp.ne.s32.totalorder %s2069_s28, %s1635_s6  ;;  %s1729_s9 = smov [#allocation8]  }
  0x5f   : > { %v1531_v11 = vld [vmem:[%s1914_s29 + $0x4] ss:$8 sps:$4 sm:$0xff]   ;;  %v1525_v14 = vld [vmem:[#allocation6 + $0x70] sm:$0xff]   ;;  %v1527_v16 = vld [vmem:[#allocation6 + $0x78] sm:$0xff]   ;;  %s1639_s11 = sshll.u32 %s1729_s9, 4  ;;  %s1640_s11 = int_to_ptr.vmem [resolvable:$false] %s1639_s11 }
  0x60   : > { %v1534_v12 = vld [vmem:[%s1914_s29 + $0x84] ss:$8 sps:$4 sm:$0xff]   ;;  %721 = vmatprep.mubr.bf16.mxu0 %v1531_v11  ;;  %v1526_v15 = vld [vmem:[#allocation6 + $0x30] sm:$0xff]   ;;  %v1528_v17 = vld [vmem:[#allocation6 + $0x38] sm:$0xff]   ;;  %p1637_p6 = pnand %p1636_p4, %p1852_p11  ;;  %s1641_s12 = scalar_lea.vmem %s1640_s11, 8192 }
  0x61   : > { %1309 = vmatpush3.bf16.msra.mxu0 %v1516_v3  ;;  %1427 = vmatpush3.bf16.msra.mxu1 %v1516_v3  ;;  %v1524_v13 = vld [vmem:[#allocation6 + $0x28] sm:$0xff]   ;;  %v1535_v20 = vld [vmem:[%s1914_s29 + $0x14] ss:$8 sps:$4 sm:$0xff]   ;;  %v1539_v22 = vld [vmem:[%s1914_s29 + $0x10] ss:$8 sps:$4 sm:$0xff]   ;;  %p1642_p12 = scmp.lt.s32.totalorder %s2069_s28, %s1640_s11  ;;  %p1643_p10 = scmp.lt.s32.totalorder %s1641_s12, %s1635_s6 }
  0x62   : > { %1310 = vmatprep.subr.bf16.mxu0 %v1517_v4  ;;  %1420 = vmatprep.subr.bf16.mxu1 %v1517_v4  ;;  %v1529_v18 = vld [vmem:[%s1914_s29] ss:$8 sps:$4 sm:$0xff]   ;;  %v1537_v21 = vld [vmem:[%s1914_s29 + $0x94] ss:$8 sps:$4 sm:$0xff]   ;;  %v1540_v23 = vld [vmem:[%s1914_s29 + $0x90] ss:$8 sps:$4 sm:$0xff]   ;;  %p1638_p8 = pneg %p1637_p6 }
  0x63   : > { %785 = vmatprep.mubr.bf16.mxu1 %v1534_v12  ;;  %v1532_v19 = vld [vmem:[%s1914_s29 + $0x80] ss:$8 sps:$4 sm:$0xff]   ;;  %v1541_v24 = vld [vmem:[%s1914_s29 + $0x24] ss:$8 sps:$4 sm:$0xff]   ;;  %v1547_v28 = vld [vmem:[%s1914_s29 + $0x34] ss:$8 sps:$4 sm:$0xff]   ;;  %p1644_p0 = por %p1643_p10, %p1642_p12 }
  0x64   : > { %v1543_v25 = vld [vmem:[%s1914_s29 + $0xa4] ss:$8 sps:$4 sm:$0xff]   ;;  %v1545_v26 = vld [vmem:[%s1914_s29 + $0x20] ss:$8 sps:$4 sm:$0xff]   ;;  %v1549_v29 = vld [vmem:[%s1914_s29 + $0xb4] ss:$8 sps:$4 sm:$0xff]  }
  0x65   : > { %1311 = vmatpush3.bf16.msra.mxu0 %v1518_v5  ;;  %1428 = vmatpush3.bf16.msra.mxu1 %v1518_v5  ;;  %v1546_v27 = vld [vmem:[%s1914_s29 + $0xa0] ss:$8 sps:$4 sm:$0xff]   ;;  %v1551_v30 = vld [vmem:[%s1914_s29 + $0x30] ss:$8 sps:$4 sm:$0xff]   ;;  %v1553_v32 = vld [vmem:[%s1914_s29 + $0x44] ss:$8 sps:$4 sm:$0xff]   ;;  %p1645_p5 = pnand %p1644_p0, %p1638_p8 }
  0x66   : > { %1312 = vmatprep.subr.bf16.mxu0 %v1519_v6  ;;  %1421 = vmatprep.subr.bf16.mxu1 %v1519_v6  ;;  %v1552_v31 = vld [vmem:[%s1914_s29 + $0xb0] ss:$8 sps:$4 sm:$0xff]   ;;  %v1555_v33 = vld [vmem:[%s1914_s29 + $0xc4] ss:$8 sps:$4 sm:$0xff]   ;;  %v1557_v34 = vld [vmem:[%s1914_s29 + $0x40] ss:$8 sps:$4 sm:$0xff]  }
  0x67   : > { %v1558_v35 = vld [vmem:[%s1914_s29 + $0xc0] ss:$8 sps:$4 sm:$0xff]   ;;  %v1559_v36 = vld [vmem:[%s1914_s29 + $0x54] ss:$8 sps:$4 sm:$0xff]   ;;  %v1563_v38 = vld [vmem:[%s1914_s29 + $0x50] ss:$8 sps:$4 sm:$0xff]  }
  0x68   : > { %v1561_v37 = vld [vmem:[%s1914_s29 + $0xd4] ss:$8 sps:$4 sm:$0xff]   ;;  %v1564_v39 = vld [vmem:[%s1914_s29 + $0xd0] ss:$8 sps:$4 sm:$0xff]   ;;  %v1565_v40 = vld [vmem:[%s1914_s29 + $0x64] ss:$8 sps:$4 sm:$0xff]  }
  0x69   : > { %1313 = vmatpush3.bf16.msra.mxu0 %v1520_v7  ;;  %1429 = vmatpush3.bf16.msra.mxu1 %v1520_v7  ;;  %v1567_v41 = vld [vmem:[%s1914_s29 + $0xe4] ss:$8 sps:$4 sm:$0xff]   ;;  %v1569_v42 = vld [vmem:[%s1914_s29 + $0x60] ss:$8 sps:$4 sm:$0xff]   ;;  %v1571_v44 = vld [vmem:[%s1914_s29 + $0x74] ss:$8 sps:$4 sm:$0xff]  }
  0x6a   : > { %1314 = vmatprep.subr.bf16.mxu0 %v1521_v8  ;;  %1422 = vmatprep.subr.bf16.mxu1 %v1521_v8  ;;  %v1570_v43 = vld [vmem:[%s1914_s29 + $0xe0] ss:$8 sps:$4 sm:$0xff]   ;;  %v1573_v45 = vld [vmem:[%s1914_s29 + $0xf4] ss:$8 sps:$4 sm:$0xff]   ;;  %v1575_v46 = vld [vmem:[%s1914_s29 + $0x70] ss:$8 sps:$4 sm:$0xff]  }
  0x6b   : > { %v1576_v47 = vld [vmem:[%s1914_s29 + $0xf0] ss:$8 sps:$4 sm:$0xff]   ;;  %v1959_v51 = vld [vmem:[%s2123_s2] ss:$0 sm:$0xff] }
  0x6c   : > { %v1964_v57 = vld [vmem:[%s2124_s3] ss:$0 sm:$0xff] }
  0x6d   : > { %1315 = vmatpush3.bf16.msra.mxu0 %v1522_v9  ;;  %1430 = vmatpush3.bf16.msra.mxu1 %v1522_v9 }
  0x6e   : > { %1316 = vmatprep.subr.bf16.mxu0 %v1523_v10  ;;  %1423 = vmatprep.subr.bf16.mxu1 %v1523_v10 }
  0x71   : > { %1317 = vmatpush3.bf16.msra.mxu0 %v1524_v13  ;;  %1431 = vmatpush3.bf16.msra.mxu1 %v1524_v13 }
  0x72   : > { %1318 = vmatprep.subr.bf16.mxu0 %v1525_v14  ;;  %1424 = vmatprep.subr.bf16.mxu1 %v1525_v14 }
  0x75   : > { %1319 = vmatpush3.bf16.msra.mxu0 %v1526_v15  ;;  %1432 = vmatpush3.bf16.msra.mxu1 %v1526_v15 }
  0x76   : > { %1320 = vmatprep.subr.bf16.mxu0 %v1527_v16  ;;  %1425 = vmatprep.subr.bf16.mxu1 %v1527_v16 }
  0x79   : > { %1321 = vmatpush3.bf16.msra.mxu0 %v1528_v17  ;;  %1433 = vmatpush3.bf16.msra.mxu1 %v1528_v17 }
  0x7c   : > { %722 = vmatmul.mubr.bf16.vlgmr.msra.gmra.mrb[0].mxu0 %v1529_v18  ;;  %786 = vmatmul.mubr.bf16.vlgmr.msra.gmra.mrb[0].mxu1 %v1532_v19 }
  0x7d   : > { %729 = vmatprep.mubr.bf16.mxu0 %v1535_v20  ;;  %793 = vmatprep.mubr.bf16.mxu1 %v1537_v21 }
  0x84   : > { %730 = vmatmul.mubr.bf16.gmra.mrb[4].mxu0 %v1539_v22  ;;  %794 = vmatmul.mubr.bf16.gmra.mrb[4].mxu1 %v1540_v23 }
  0x85   : > { %737 = vmatprep.mubr.bf16.mxu0 %v1541_v24  ;;  %801 = vmatprep.mubr.bf16.mxu1 %v1543_v25 }
  0x8c   : > { %738 = vmatmul.mubr.bf16.gmra.mrb[8].mxu0 %v1545_v26  ;;  %802 = vmatmul.mubr.bf16.gmra.mrb[8].mxu1 %v1546_v27 }
  0x8d   : > { %745 = vmatprep.mubr.bf16.mxu0 %v1547_v28  ;;  %809 = vmatprep.mubr.bf16.mxu1 %v1549_v29 }
  0x94   : > { %746 = vmatmul.mubr.bf16.gmra.mrb[12].mxu0 %v1551_v30  ;;  %810 = vmatmul.mubr.bf16.gmra.mrb[12].mxu1 %v1552_v31 }
  0x95   : > { %753 = vmatprep.mubr.bf16.mxu0 %v1553_v32  ;;  %817 = vmatprep.mubr.bf16.mxu1 %v1555_v33 }
  0x9c   : > { %754 = vmatmul.mubr.bf16.gmra.mrb[16].mxu0 %v1557_v34  ;;  %818 = vmatmul.mubr.bf16.gmra.mrb[16].mxu1 %v1558_v35 }
  0x9d   : > { %761 = vmatprep.mubr.bf16.mxu0 %v1559_v36  ;;  %825 = vmatprep.mubr.bf16.mxu1 %v1561_v37 }
  0xa4   : > { %762 = vmatmul.mubr.bf16.gmra.mrb[20].mxu0 %v1563_v38  ;;  %826 = vmatmul.mubr.bf16.gmra.mrb[20].mxu1 %v1564_v39 }
  0xa5   : > { %769 = vmatprep.mubr.bf16.mxu0 %v1565_v40  ;;  %833 = vmatprep.mubr.bf16.mxu1 %v1567_v41 }
  0xac   : > { %770 = vmatmul.mubr.bf16.gmra.mrb[24].mxu0 %v1569_v42  ;;  %834 = vmatmul.mubr.bf16.gmra.mrb[24].mxu1 %v1570_v43 }
  0xad   : > { %777 = vmatprep.mubr.bf16.mxu0 %v1571_v44  ;;  %841 = vmatprep.mubr.bf16.mxu1 %v1573_v45 }
  0xb4   : > { %778 = vmatmul.mubr.bf16.gmra.mrb[28].mxu0 %v1575_v46  ;;  %842 = vmatmul.mubr.bf16.gmra.mrb[28].mxu1 %v1576_v47 }
 0x14f   : > { %v1322_v48 = vpop.f32.mrb[0].mxu0  ;;  %v1370_v49 = vpop.f32.mrb[0].mxu1 }
 0x150   : > { %v1323_v50 = vpop.f32.mrb[1].mxu0  ;;  %v1371_v52 = vpop.f32.mrb[1].mxu1 }
 0x151   : > { %v1324_v53 = vadd.f32 %v1323_v50, %v1322_v48  ;;  %v1372_v54 = vadd.f32 %v1371_v52, %v1370_v49  ;;  %v1325_v55 = vpop.f32.mrb[2].mxu0  ;;  %v1373_v56 = vpop.f32.mrb[2].mxu1 }
 0x152   : > { %v1326_v58 = vpop.f32.mrb[3].mxu0  ;;  %v1374_v59 = vpop.f32.mrb[3].mxu1 }
 0x153   : > { %v956_v60 = vmul.f32 %v1324_v53, %v1959_v51  ;;  %v972_v61 = vmul.f32 %v1372_v54, %v1959_v51  ;;  %v1327_v62 = vadd.f32 %v1326_v58, %v1325_v55  ;;  %v1375_v63 = vadd.f32 %v1374_v59, %v1373_v56 }
 0x155   : > { %v995_v0 = vadd.f32 %v1964_v57, %v956_v60  ;;  %v1011_v1 = vadd.f32 %v1964_v57, %v972_v61  ;;  %v957_v2 = vmul.f32 %v1327_v62, %v1959_v51  ;;  %v973_v3 = vmul.f32 %v1375_v63, %v1959_v51 }
 0x157   : > { %v1027_v4 = vmax.f32 %v995_v0, 0.0  ;;  %v1043_v5 = vmax.f32 %v1011_v1, 0.0  ;;  %v996_v6 = vadd.f32 %v1964_v57, %v957_v2  ;;  %v1012_v7 = vadd.f32 %v1964_v57, %v973_v3  ;;  %v1328_v8 = vpop.f32.mrb[4].mxu0  ;;  %v1376_v9 = vpop.f32.mrb[4].mxu1 }
 0x158   : > { %v1329_v10 = vpop.f32.mrb[5].mxu0  ;;  %v1377_v11 = vpop.f32.mrb[5].mxu1 }
 0x159   : > { %1059 = vst [vmem:[%s1976_s21] sm:$0xff] %v1027_v4  ;;  %1075 = vst [vmem:[%s1976_s21 + $0x80] sm:$0xff] %v1043_v5  ;;  %v1028_v12 = vmax.f32 %v996_v6, 0.0  ;;  %v1044_v13 = vmax.f32 %v1012_v7, 0.0  ;;  %v1330_v14 = vadd.f32 %v1329_v10, %v1328_v8  ;;  %v1378_v15 = vadd.f32 %v1377_v11, %v1376_v9  ;;  %v1331_v16 = vpop.f32.mrb[6].mxu0  ;;  %v1379_v17 = vpop.f32.mrb[6].mxu1 }
 0x15a   : > { %v1332_v18 = vpop.f32.mrb[7].mxu0  ;;  %v1380_v19 = vpop.f32.mrb[7].mxu1 }
 0x15b   : > { %1060 = vst [vmem:[%s1976_s21 + $0x8] sm:$0xff] %v1028_v12  ;;  %1076 = vst [vmem:[%s1976_s21 + $0x88] sm:$0xff] %v1044_v13  ;;  %v958_v20 = vmul.f32 %v1330_v14, %v1959_v51  ;;  %v974_v21 = vmul.f32 %v1378_v15, %v1959_v51  ;;  %v1333_v22 = vadd.f32 %v1332_v18, %v1331_v16 }
 0x15c   : > { %v1381_v23 = vadd.f32 %v1380_v19, %v1379_v17 }
 0x15d   : > { %v997_v24 = vadd.f32 %v1964_v57, %v958_v20  ;;  %v1013_v25 = vadd.f32 %v1964_v57, %v974_v21  ;;  %v959_v26 = vmul.f32 %v1333_v22, %v1959_v51 }
 0x15e   : > { %v975_v27 = vmul.f32 %v1381_v23, %v1959_v51 }
 0x15f   : > { %v1029_v28 = vmax.f32 %v997_v24, 0.0  ;;  %v1045_v29 = vmax.f32 %v1013_v25, 0.0  ;;  %v998_v30 = vadd.f32 %v1964_v57, %v959_v26  ;;  %v1334_v32 = vpop.f32.mrb[8].mxu0  ;;  %v1382_v33 = vpop.f32.mrb[8].mxu1 }
 0x160   : > { %v1014_v31 = vadd.f32 %v1964_v57, %v975_v27  ;;  %v1335_v34 = vpop.f32.mrb[9].mxu0  ;;  %v1383_v35 = vpop.f32.mrb[9].mxu1 }
 0x161   : > { %1061 = vst [vmem:[%s1976_s21 + $0x10] sm:$0xff] %v1029_v28  ;;  %1077 = vst [vmem:[%s1976_s21 + $0x90] sm:$0xff] %v1045_v29  ;;  %v1030_v36 = vmax.f32 %v998_v30, 0.0  ;;  %v1336_v38 = vadd.f32 %v1335_v34, %v1334_v32  ;;  %v1384_v39 = vadd.f32 %v1383_v35, %v1382_v33  ;;  %v1337_v40 = vpop.f32.mrb[10].mxu0  ;;  %v1385_v41 = vpop.f32.mrb[10].mxu1 }
 0x162   : > { %v1046_v37 = vmax.f32 %v1014_v31, 0.0  ;;  %v1338_v42 = vpop.f32.mrb[11].mxu0  ;;  %v1386_v43 = vpop.f32.mrb[11].mxu1 }
 0x163   : > { %1062 = vst [vmem:[%s1976_s21 + $0x18] sm:$0xff] %v1030_v36  ;;  %v960_v44 = vmul.f32 %v1336_v38, %v1959_v51  ;;  %v976_v45 = vmul.f32 %v1384_v39, %v1959_v51  ;;  %v1339_v46 = vadd.f32 %v1338_v42, %v1337_v40  ;;  %v1387_v47 = vadd.f32 %v1386_v43, %v1385_v41 }
 0x164   : > { %1078 = vst [vmem:[%s1976_s21 + $0x98] sm:$0xff] %v1046_v37 }
 0x165   : > { %v999_v48 = vadd.f32 %v1964_v57, %v960_v44  ;;  %v1015_v49 = vadd.f32 %v1964_v57, %v976_v45  ;;  %v961_v50 = vmul.f32 %v1339_v46, %v1959_v51  ;;  %v977_v52 = vmul.f32 %v1387_v47, %v1959_v51 }
 0x167   : > { %v1031_v53 = vmax.f32 %v999_v48, 0.0  ;;  %v1047_v54 = vmax.f32 %v1015_v49, 0.0  ;;  %v1000_v55 = vadd.f32 %v1964_v57, %v961_v50  ;;  %v1016_v56 = vadd.f32 %v1964_v57, %v977_v52  ;;  %v1340_v58 = vpop.f32.mrb[12].mxu0  ;;  %v1388_v59 = vpop.f32.mrb[12].mxu1 }
 0x168   : > { %v1341_v60 = vpop.f32.mrb[13].mxu0  ;;  %v1389_v61 = vpop.f32.mrb[13].mxu1 }
 0x169   : > { %1063 = vst [vmem:[%s1976_s21 + $0x20] sm:$0xff] %v1031_v53  ;;  %1079 = vst [vmem:[%s1976_s21 + $0xa0] sm:$0xff] %v1047_v54  ;;  %v1032_v62 = vmax.f32 %v1000_v55, 0.0  ;;  %v1048_v63 = vmax.f32 %v1016_v56, 0.0  ;;  %v1342_v0 = vadd.f32 %v1341_v60, %v1340_v58  ;;  %v1390_v1 = vadd.f32 %v1389_v61, %v1388_v59  ;;  %v1343_v2 = vpop.f32.mrb[14].mxu0  ;;  %v1391_v3 = vpop.f32.mrb[14].mxu1 }
 0x16a   : > { %v1344_v4 = vpop.f32.mrb[15].mxu0  ;;  %v1392_v5 = vpop.f32.mrb[15].mxu1 }
 0x16b   : > { %1064 = vst [vmem:[%s1976_s21 + $0x28] sm:$0xff] %v1032_v62  ;;  %1080 = vst [vmem:[%s1976_s21 + $0xa8] sm:$0xff] %v1048_v63  ;;  %v962_v6 = vmul.f32 %v1342_v0, %v1959_v51  ;;  %v978_v7 = vmul.f32 %v1390_v1, %v1959_v51  ;;  %v1345_v8 = vadd.f32 %v1344_v4, %v1343_v2 }
 0x16c   : > { %v1393_v9 = vadd.f32 %v1392_v5, %v1391_v3 }
 0x16d   : > { %v1001_v10 = vadd.f32 %v1964_v57, %v962_v6  ;;  %v1017_v11 = vadd.f32 %v1964_v57, %v978_v7  ;;  %v963_v12 = vmul.f32 %v1345_v8, %v1959_v51 }
 0x16e   : > { %v979_v13 = vmul.f32 %v1393_v9, %v1959_v51 }
 0x16f   : > { %v1033_v14 = vmax.f32 %v1001_v10, 0.0  ;;  %v1049_v15 = vmax.f32 %v1017_v11, 0.0  ;;  %v1002_v16 = vadd.f32 %v1964_v57, %v963_v12  ;;  %v1346_v18 = vpop.f32.mrb[16].mxu0  ;;  %v1394_v19 = vpop.f32.mrb[16].mxu1 }
 0x170   : > { %v1018_v17 = vadd.f32 %v1964_v57, %v979_v13  ;;  %v1347_v20 = vpop.f32.mrb[17].mxu0  ;;  %v1395_v21 = vpop.f32.mrb[17].mxu1 }
 0x171   : > { %1065 = vst [vmem:[%s1976_s21 + $0x30] sm:$0xff] %v1033_v14  ;;  %1081 = vst [vmem:[%s1976_s21 + $0xb0] sm:$0xff] %v1049_v15  ;;  %v1034_v22 = vmax.f32 %v1002_v16, 0.0  ;;  %v1348_v24 = vadd.f32 %v1347_v20, %v1346_v18  ;;  %v1396_v25 = vadd.f32 %v1395_v21, %v1394_v19  ;;  %v1349_v26 = vpop.f32.mrb[18].mxu0  ;;  %v1397_v27 = vpop.f32.mrb[18].mxu1 }
 0x172   : > { %v1050_v23 = vmax.f32 %v1018_v17, 0.0  ;;  %v1350_v28 = vpop.f32.mrb[19].mxu0  ;;  %v1398_v29 = vpop.f32.mrb[19].mxu1 }
 0x173   : > { %1066 = vst [vmem:[%s1976_s21 + $0x38] sm:$0xff] %v1034_v22  ;;  %v964_v30 = vmul.f32 %v1348_v24, %v1959_v51  ;;  %v980_v31 = vmul.f32 %v1396_v25, %v1959_v51  ;;  %v1351_v32 = vadd.f32 %v1350_v28, %v1349_v26  ;;  %v1399_v33 = vadd.f32 %v1398_v29, %v1397_v27 }
 0x174   : > { %1082 = vst [vmem:[%s1976_s21 + $0xb8] sm:$0xff] %v1050_v23 }
 0x175   : > { %v1003_v34 = vadd.f32 %v1964_v57, %v964_v30  ;;  %v1019_v35 = vadd.f32 %v1964_v57, %v980_v31  ;;  %v965_v36 = vmul.f32 %v1351_v32, %v1959_v51  ;;  %v981_v37 = vmul.f32 %v1399_v33, %v1959_v51 }
 0x177   : > { %v1035_v38 = vmax.f32 %v1003_v34, 0.0  ;;  %v1051_v39 = vmax.f32 %v1019_v35, 0.0  ;;  %v1004_v40 = vadd.f32 %v1964_v57, %v965_v36  ;;  %v1020_v41 = vadd.f32 %v1964_v57, %v981_v37  ;;  %v1352_v42 = vpop.f32.mrb[20].mxu0  ;;  %v1400_v43 = vpop.f32.mrb[20].mxu1 }
 0x178   : > { %v1353_v44 = vpop.f32.mrb[21].mxu0  ;;  %v1401_v45 = vpop.f32.mrb[21].mxu1 }
 0x179   : > { %1067 = vst [vmem:[%s1976_s21 + $0x40] sm:$0xff] %v1035_v38  ;;  %1083 = vst [vmem:[%s1976_s21 + $0xc0] sm:$0xff] %v1051_v39  ;;  %v1036_v46 = vmax.f32 %v1004_v40, 0.0  ;;  %v1052_v47 = vmax.f32 %v1020_v41, 0.0  ;;  %v1354_v48 = vadd.f32 %v1353_v44, %v1352_v42  ;;  %v1402_v49 = vadd.f32 %v1401_v45, %v1400_v43  ;;  %v1355_v50 = vpop.f32.mrb[22].mxu0  ;;  %v1403_v52 = vpop.f32.mrb[22].mxu1 }
 0x17a   : > { %v1356_v53 = vpop.f32.mrb[23].mxu0  ;;  %v1404_v54 = vpop.f32.mrb[23].mxu1 }
 0x17b   : > { %1068 = vst [vmem:[%s1976_s21 + $0x48] sm:$0xff] %v1036_v46  ;;  %1084 = vst [vmem:[%s1976_s21 + $0xc8] sm:$0xff] %v1052_v47  ;;  %v966_v55 = vmul.f32 %v1354_v48, %v1959_v51  ;;  %v982_v56 = vmul.f32 %v1402_v49, %v1959_v51  ;;  %v1357_v58 = vadd.f32 %v1356_v53, %v1355_v50 }
 0x17c   : > { %v1405_v59 = vadd.f32 %v1404_v54, %v1403_v52 }
 0x17d   : > { %v1005_v60 = vadd.f32 %v1964_v57, %v966_v55  ;;  %v1021_v61 = vadd.f32 %v1964_v57, %v982_v56  ;;  %v967_v62 = vmul.f32 %v1357_v58, %v1959_v51 }
 0x17e   : > { %v983_v63 = vmul.f32 %v1405_v59, %v1959_v51 }
 0x17f   : > { %v1037_v0 = vmax.f32 %v1005_v60, 0.0  ;;  %v1053_v1 = vmax.f32 %v1021_v61, 0.0  ;;  %v1006_v2 = vadd.f32 %v1964_v57, %v967_v62  ;;  %v1358_v4 = vpop.f32.mrb[24].mxu0  ;;  %v1406_v5 = vpop.f32.mrb[24].mxu1 }
 0x180   : > { %v1022_v3 = vadd.f32 %v1964_v57, %v983_v63  ;;  %v1359_v6 = vpop.f32.mrb[25].mxu0  ;;  %v1407_v7 = vpop.f32.mrb[25].mxu1 }
 0x181   : > { %1069 = vst [vmem:[%s1976_s21 + $0x50] sm:$0xff] %v1037_v0  ;;  %1085 = vst [vmem:[%s1976_s21 + $0xd0] sm:$0xff] %v1053_v1  ;;  %v1038_v8 = vmax.f32 %v1006_v2, 0.0  ;;  %v1360_v10 = vadd.f32 %v1359_v6, %v1358_v4  ;;  %v1408_v11 = vadd.f32 %v1407_v7, %v1406_v5  ;;  %v1361_v12 = vpop.f32.mrb[26].mxu0  ;;  %v1409_v13 = vpop.f32.mrb[26].mxu1 }
 0x182   : > { %v1054_v9 = vmax.f32 %v1022_v3, 0.0  ;;  %v1362_v14 = vpop.f32.mrb[27].mxu0  ;;  %v1410_v15 = vpop.f32.mrb[27].mxu1 }
 0x183   : > { %1070 = vst [vmem:[%s1976_s21 + $0x58] sm:$0xff] %v1038_v8  ;;  %v968_v16 = vmul.f32 %v1360_v10, %v1959_v51  ;;  %v984_v17 = vmul.f32 %v1408_v11, %v1959_v51  ;;  %v1363_v18 = vadd.f32 %v1362_v14, %v1361_v12  ;;  %v1411_v19 = vadd.f32 %v1410_v15, %v1409_v13 }
 0x184   : > { %1086 = vst [vmem:[%s1976_s21 + $0xd8] sm:$0xff] %v1054_v9 }
 0x185   : > { %v1007_v20 = vadd.f32 %v1964_v57, %v968_v16  ;;  %v1023_v21 = vadd.f32 %v1964_v57, %v984_v17  ;;  %v969_v22 = vmul.f32 %v1363_v18, %v1959_v51  ;;  %v985_v23 = vmul.f32 %v1411_v19, %v1959_v51 }
 0x187   : > { %v1039_v24 = vmax.f32 %v1007_v20, 0.0  ;;  %v1055_v25 = vmax.f32 %v1023_v21, 0.0  ;;  %v1008_v26 = vadd.f32 %v1964_v57, %v969_v22  ;;  %v1024_v27 = vadd.f32 %v1964_v57, %v985_v23  ;;  %v1364_v28 = vpop.f32.mrb[28].mxu0  ;;  %v1412_v29 = vpop.f32.mrb[28].mxu1 }
 0x188   : > { %v1365_v30 = vpop.f32.mrb[29].mxu0  ;;  %v1413_v31 = vpop.f32.mrb[29].mxu1 }
 0x189   : > { %1071 = vst [vmem:[%s1976_s21 + $0x60] sm:$0xff] %v1039_v24  ;;  %1087 = vst [vmem:[%s1976_s21 + $0xe0] sm:$0xff] %v1055_v25  ;;  %v1040_v32 = vmax.f32 %v1008_v26, 0.0  ;;  %v1056_v33 = vmax.f32 %v1024_v27, 0.0  ;;  %v1366_v34 = vadd.f32 %v1365_v30, %v1364_v28  ;;  %v1414_v35 = vadd.f32 %v1413_v31, %v1412_v29  ;;  %v1367_v36 = vpop.f32.mrb[30].mxu0  ;;  %v1415_v37 = vpop.f32.mrb[30].mxu1 }
 0x18a   : > { %v1368_v38 = vpop.f32.mrb[31].mxu0  ;;  %v1416_v39 = vpop.f32.mrb[31].mxu1 }
 0x18b   : > { %1072 = vst [vmem:[%s1976_s21 + $0x68] sm:$0xff] %v1040_v32  ;;  %1088 = vst [vmem:[%s1976_s21 + $0xe8] sm:$0xff] %v1056_v33  ;;  %v970_v40 = vmul.f32 %v1366_v34, %v1959_v51  ;;  %v986_v41 = vmul.f32 %v1414_v35, %v1959_v51  ;;  %v1369_v42 = vadd.f32 %v1368_v38, %v1367_v36 }
 0x18c   : > { %v1417_v43 = vadd.f32 %v1416_v39, %v1415_v37 }
 0x18d   : > { %v1009_v44 = vadd.f32 %v1964_v57, %v970_v40  ;;  %v1025_v45 = vadd.f32 %v1964_v57, %v986_v41  ;;  %v971_v46 = vmul.f32 %v1369_v42, %v1959_v51 }
 0x18e   : > { %v987_v47 = vmul.f32 %v1417_v43, %v1959_v51 }
 0x18f   : > { %v1041_v48 = vmax.f32 %v1009_v44, 0.0  ;;  %v1057_v49 = vmax.f32 %v1025_v45, 0.0  ;;  %v1010_v50 = vadd.f32 %v1964_v57, %v971_v46 }
 0x190   : > { %v1026_v52 = vadd.f32 %v1964_v57, %v987_v47 }
 0x191   : > { %1073 = vst [vmem:[%s1976_s21 + $0x70] sm:$0xff] %v1041_v48  ;;  %1089 = vst [vmem:[%s1976_s21 + $0xf0] sm:$0xff] %v1057_v49  ;;  %v1042_v51 = vmax.f32 %v1010_v50, 0.0 }
 0x192   : > { %v1058_v53 = vmax.f32 %v1026_v52, 0.0 }
 0x193   : > { %1074 = vst [vmem:[%s1976_s21 + $0x78] sm:$0xff] %v1042_v51 }
 0x194   : > { %1090 = vst [vmem:[%s1976_s21 + $0xf8] sm:$0xff] %v1058_v53 }
 0x195   : > { %1648 = shalt.err (!%p1645_p5)
}
 0x196   : > { %s1649_s29 = scalar_lea.hbm %s2067_s30, 4096  ;;  %s1653_s27 = scalar_lea.hbm %s2125_s4, 32768 }
 0x197   : > { %p1650_p9 = scmp.ne.s32.totalorder %s2067_s30, %s1649_s29  ;;  %p1654_p3 = scmp.lt.u32.totalorder %s2067_s30, %s2125_s4 }
 0x198   : > { %p1655_p7 = scmp.lt.u32.totalorder %s1653_s27, %s1649_s29  ;;  %p1657_p4 = scmp.lt.u32.totalorder %s1649_s29, %s2067_s30 }
 0x199   : > { %p1651_p1 = pnand %p1650_p9, %p1852_p11 }
 0x19a   : > { %p1656_p13 = por %p1655_p7, %p1654_p3 }
 0x19b   : > { %p1652_p2 = pneg %p1651_p1 }
 0x19c   : > { %p1658_p6 = por %p1657_p4, %p1656_p13 }
 0x19e   : > { %p1659_p8 = pnand %p1658_p6, %p1652_p2 }
 0x1a0   : > { %1662 = shalt.err (!%p1659_p8)
}
 0x1a1   : > { %s1730_s22 = smov 128   ;;  %s1731_s13 = smov 8  }
 0x1a2   : > { %1440 = dma.vmem_to_hbm [thread:$0]  (%p1852_p11), %s2069_s28, 4096, %s2067_s30, %s1092_s18, %s1730_s22, %s1730_s22, %s1731_s13  }
 0x1a3 PF: > { %p1457_p12 = scmp.ge.s32.totalorder %s1721_s20, 2  ;;  %s1121_s24 = sand.u32 1, %s1701_s15  }
 0x1a4   : > { %p2143_p10 = scmp.ne.s32.totalorder %s2133_s26, 0  ;;  %s1122_s6 = scalar_lea.sflag [#allocation5], %s1121_s24 }
 0x1a6   : > { %p1451_p0 = pnand %p1457_p12, %p2143_p10 }
 0x1a8   : > { %1696 = dma.done.wait (!%p1451_p0), %s1122_s6, 4096  }
 0x1a9   : > { %1698 = vsyncadd (!%p1451_p0), %s1122_s6, 4294963200  ;;  %s21_s20 = sadd.s32 1, %s1721_s20   ;;  %s2144_s15 = smov %s1705_s16 }
 0x1aa   : > { %p18_p5 = scmp.ge.s32.totalorder %s21_s20, 10   ;;  %s2145_s16 = smov %s1709_s17 }
 0x1ab   : > { %s2146_s17 = smov %s1861_s10  ;;  %s2147_s18 = smov %s1717_s19 }
 0x1ac   : > { %s2148_s19 = smov %s2150_s5  ;;  %20 = sbr.rel (!%p18_p5) target bundleno = 7 (0x7), region = 100 }
 0x1b3   :  { %1127 = vsyncpa [#allocation4], 1 }
 0x1b4   :  { %1129 = vsyncpa [#allocation4 + $0x1], 1 }
 0x1b5   :  { %1130 = vsyncpa [#allocation7], 1 }
 0x1b6   :  { %1131 = vsyncpa [#allocation5], 1 }
 0x1b7   :  { %1133 = vsyncpa [#allocation5 + $0x1], 1 }

</bundles_post_ra>
